<compile_context>
chip_gen: v7x
topology: tpu7x:2x2x1
jax: 0.10.0
libtpu: 0.0.40
codegen_flags: <defaults>
</compile_context>

<pallas_src>
import jax
import jax.numpy as jnp
from jax.experimental import pallas as pl
from jax.experimental.pallas import tpu as pltpu

HIDDEN = 64


def _round_up(x, m):
    return (x + m - 1) // m * m


def deepset_kernel(x_ref, w1_ref, b1_ref, w2_ref, b2_ref, wf_ref, bf_ref,
                   w5_ref, b5_ref, w6_ref, b6_ref, out_ref):
    # x_ref: (TB, n*d) f32 (cast to bf16 here -> no wrapper-side HBM round trip);
    # weights bf16 (VMEM-resident), biases f32; out_ref: (TB, d) f32.
    x = x_ref[...].astype(jnp.bfloat16)
    h = jnp.dot(x, w1_ref[...], preferred_element_type=jnp.float32) + b1_ref[...]
    h = jnp.maximum(h, 0.0).astype(jnp.bfloat16)
    h = jnp.dot(h, w2_ref[...], preferred_element_type=jnp.float32) + b2_ref[...]
    h = jnp.maximum(h, 0.0).astype(jnp.bfloat16)
    # Folded (phi's last Linear -> sum over N -> rho's first Linear): exact algebra,
    # one 64x64 matmul replaces the two widest matmuls of the chain.
    h = jnp.dot(h, wf_ref[...], preferred_element_type=jnp.float32) + bf_ref[...]
    h = jnp.maximum(h, 0.0).astype(jnp.bfloat16)
    h = jnp.dot(h, w5_ref[...], preferred_element_type=jnp.float32) + b5_ref[...]
    h = jnp.maximum(h, 0.0).astype(jnp.bfloat16)
    out_ref[...] = jnp.dot(h, w6_ref[...], preferred_element_type=jnp.float32) + b6_ref[...]


def fold_params(params, n, d):
    """wf = w3 @ S @ w4, bf = b3 @ S @ w4 + b4, where S = stacked identities (= sum over N)."""
    f32 = jnp.float32
    seg = jnp.tile(jnp.eye(d, dtype=f32), (n, 1))          # (n*d, d)
    sw4 = seg @ params["w4"]                                # (n*d, 64)
    wf = params["w3"] @ sw4                                 # (64, 64)
    bf = params["b3"] @ sw4 + params["b4"]                  # (1, 64)
    # NOTE: wf entries are sums over n segments; the later bf16 cast of wf loses a little
    # accuracy vs the f32 reference only when n is very large (fine at small n, checked below).
    return wf, bf


def _pick_tb(b, nd, d, weight_bytes, vmem_budget_bytes=24 << 20):
    """Batch tile: as large as the VMEM budget allows, clamped to the real batch, and
    split so v7x's two TensorCores both get work once the batch is big enough."""
    # Per-row working set: double-buffered f32 x tile + double-buffered f32 out tile
    # + ~HIDDEN-wide f32/bf16 intermediates.
    per_row = 2 * nd * 4 + 2 * d * 4 + HIDDEN * 16
    avail = max(vmem_budget_bytes - 2 * weight_bytes, per_row * 8)
    tb = min(max(avail // per_row, 8), 2048)   # step overhead fully amortized well before 2048
    if tb >= b:
        # Whole batch in one block (block dim == full array dim is always legal);
        # split in two for the second TensorCore once the batch is large enough.
        return _round_up(pl.cdiv(b, 2), 8) if b >= 512 else b
    return _round_up(tb, 8)


def deepset_forward(x, params, *, tb=None):
    """x: (B, N, D) float32. params: dict of phi/rho weights. Returns (B, D) float32."""
    b, n, d = x.shape
    nd = n * d

    wf, bf = fold_params(params, n, d)
    bdt = jnp.bfloat16
    weights = (
        params["w1"].astype(bdt), params["b1"],
        params["w2"].astype(bdt), params["b2"],
        wf.astype(bdt), bf,
        params["w5"].astype(bdt), params["b5"],
        params["w6"].astype(bdt), params["b6"],
    )
    weight_bytes = sum(int(w.size) * w.dtype.itemsize for w in weights)

    if tb is None:
        tb = _pick_tb(b, nd, d, weight_bytes)
    grid = (pl.cdiv(b, tb),)

    # (B, N, D) -> (B, N*D) is a layout-preserving (free) reshape; dtype stays f32 and
    # the bf16 cast happens inside the kernel, so x is read from HBM exactly once.
    x_flat = x.reshape(b, nd)

    def const_spec(arr):
        # Whole array, same block index every grid step -> resident in VMEM.
        return pl.BlockSpec(arr.shape, lambda i: (0, 0))

    cost = pl.CostEstimate(
        flops=2 * b * (nd * HIDDEN + 3 * HIDDEN * HIDDEN + HIDDEN * d),
        transcendentals=0,
        bytes_accessed=b * nd * 4 + b * d * 4 + weight_bytes,
    )

    out = pl.pallas_call(
        deepset_kernel,
        out_shape=jax.ShapeDtypeStruct((b, d), jnp.float32),
        grid_spec=pltpu.PrefetchScalarGridSpec(
            num_scalar_prefetch=0,
            grid=grid,
            in_specs=[pl.BlockSpec((tb, nd), lambda i: (i, 0))]
                     + [const_spec(w) for w in weights],
            out_specs=pl.BlockSpec((tb, d), lambda i: (i, 0)),
        ),
        compiler_params=pltpu.CompilerParams(
            dimension_semantics=("parallel",),
            # Above v5e's 16 MiB scoped default, comfortably under v7x's 64 MiB physical.
            vmem_limit_bytes=40 << 20,
        ),
        cost_estimate=cost,
    )(x_flat, *weights)

    return out


def init_params(key, input_dim, output_dim, hidden=HIDDEN):
    """Deterministic PyTorch-Linear-style init; weights stored as (in, out)."""
    def linear(key, fan_in, fan_out):
        kw, kb = jax.random.split(key)
        bound = 1.0 / jnp.sqrt(fan_in)
        w = jax.random.uniform(kw, (fan_in, fan_out), jnp.float32, -bound, bound)
        b = jax.random.uniform(kb, (1, fan_out), jnp.float32, -bound, bound)
        return w, b

    keys = jax.random.split(key, 6)
    w1, b1 = linear(keys[0], input_dim, hidden)
    w2, b2 = linear(keys[1], hidden, hidden)
    w3, b3 = linear(keys[2], hidden, input_dim)
    w4, b4 = linear(keys[3], output_dim, hidden)
    w5, b5 = linear(keys[4], hidden, hidden)
    w6, b6 = linear(keys[5], hidden, output_dim)
    return dict(w1=w1, b1=b1, w2=w2, b2=b2, w3=w3, b3=b3,
                w4=w4, b4=b4, w5=w5, b5=b5, w6=w6, b6=b6)


def deepset_reference(x, params):
    """Pure-f32 JAX mirror of the PyTorch forward, for semantic verification."""
    b, n, d = x.shape
    h = x.reshape(b, n * d)
    h = jnp.maximum(h @ params["w1"] + params["b1"], 0.0)
    h = jnp.maximum(h @ params["w2"] + params["b2"], 0.0)
    h = h @ params["w3"] + params["b3"]
    z = h.reshape(b, n, d).sum(axis=1)
    h = jnp.maximum(z @ params["w4"] + params["b4"], 0.0)
    h = jnp.maximum(h @ params["w5"] + params["b5"], 0.0)
    return h @ params["w6"] + params["b6"]


def deepset_mirror_bf16(x, params):
    """Pure-JAX mirror of the exact kernel arithmetic (bf16 ops, f32 accumulation)."""
    b, n, d = x.shape
    wf, bf = fold_params(params, n, d)
    bdt = jnp.bfloat16

    def lin(h, w, bias):
        return jnp.dot(h, w.astype(bdt), preferred_element_type=jnp.float32) + bias

    h = x.reshape(b, n * d).astype(bdt)
    h = jnp.maximum(lin(h, params["w1"], params["b1"]), 0.0).astype(bdt)
    h = jnp.maximum(lin(h, params["w2"], params["b2"]), 0.0).astype(bdt)
    h = jnp.maximum(lin(h, wf, bf), 0.0).astype(bdt)
    h = jnp.maximum(lin(h, params["w5"], params["b5"]), 0.0).astype(bdt)
    return lin(h, params["w6"], params["b6"])


if __name__ == "__main__":
    # Small shapes consistent with the module: input_dim = n*d, output_dim = d.
    B, N, D = 2, 8, 16
    INPUT_DIM = N * D      # 128
    OUTPUT_DIM = D         # 16

    key = jax.random.PRNGKey(0)
    kx, kp = jax.random.split(key)
    x = jax.random.normal(kx, (B, N, D), dtype=jnp.float32)
    params = init_params(kp, INPUT_DIM, OUTPUT_DIM)

    fwd = jax.jit(deepset_forward)
    out = jax.block_until_ready(fwd(x, params))
    assert out.shape == (B, OUTPUT_DIM)

    # Tight check against a pure-JAX mirror of the exact kernel arithmetic.
    mirror = deepset_mirror_bf16(x, params)
    assert jnp.allclose(out, mirror, atol=1e-3, rtol=1e-3), "mismatch vs bf16 mirror"

    # Semantic check against the f32 PyTorch-style forward (bf16-level tolerance).
    ref = deepset_reference(x, params)
    assert jnp.allclose(out, ref, atol=5e-2, rtol=5e-2), "mismatch vs f32 reference"

    print("KERNEL_OK")
</pallas_src>

<mosaic_0001>
module attributes {stable_mosaic.version = 11 : i64} {
  func.func @deepset_kernel(%arg0: i32, %arg1: memref<2x128xf32, #tpu.memory_space<vmem>>, %arg2: memref<128x64xbf16, #tpu.memory_space<vmem>>, %arg3: memref<1x64xf32, #tpu.memory_space<vmem>>, %arg4: memref<64x64xbf16, #tpu.memory_space<vmem>>, %arg5: memref<1x64xf32, #tpu.memory_space<vmem>>, %arg6: memref<64x64xbf16, #tpu.memory_space<vmem>>, %arg7: memref<1x64xf32, #tpu.memory_space<vmem>>, %arg8: memref<64x64xbf16, #tpu.memory_space<vmem>>, %arg9: memref<1x64xf32, #tpu.memory_space<vmem>>, %arg10: memref<64x16xbf16, #tpu.memory_space<vmem>>, %arg11: memref<1x16xf32, #tpu.memory_space<vmem>>, %arg12: memref<2x16xf32, #tpu.memory_space<vmem>>) attributes {dimension_semantics = [#tpu.dimension_semantics<parallel>], iteration_bounds = array<i64: 1>, scalar_prefetch = 0 : i64, scratch_operands = 0 : i64, tpu.core_type = #tpu.core_type<tc>, window_params = [{transform_indices = @transform_0, window_bounds = array<i64: 2, 128>}, {pipeline_mode = #tpu.pipeline_mode<synchronous>, transform_indices = @transform_1, window_bounds = array<i64: 128, 64>}, {pipeline_mode = #tpu.pipeline_mode<synchronous>, transform_indices = @transform_2, window_bounds = array<i64: 1, 64>}, {pipeline_mode = #tpu.pipeline_mode<synchronous>, transform_indices = @transform_3, window_bounds = array<i64: 64, 64>}, {pipeline_mode = #tpu.pipeline_mode<synchronous>, transform_indices = @transform_4, window_bounds = array<i64: 1, 64>}, {pipeline_mode = #tpu.pipeline_mode<synchronous>, transform_indices = @transform_5, window_bounds = array<i64: 64, 64>}, {pipeline_mode = #tpu.pipeline_mode<synchronous>, transform_indices = @transform_6, window_bounds = array<i64: 1, 64>}, {pipeline_mode = #tpu.pipeline_mode<synchronous>, transform_indices = @transform_7, window_bounds = array<i64: 64, 64>}, {pipeline_mode = #tpu.pipeline_mode<synchronous>, transform_indices = @transform_8, window_bounds = array<i64: 1, 64>}, {pipeline_mode = #tpu.pipeline_mode<synchronous>, transform_indices = @transform_9, window_bounds = array<i64: 64, 16>}, {pipeline_mode = #tpu.pipeline_mode<synchronous>, transform_indices = @transform_10, window_bounds = array<i64: 1, 16>}, {transform_indices = @transform_11, window_bounds = array<i64: 2, 16>}]} {
    %c0 = arith.constant 0 : index
    %c0_0 = arith.constant 0 : index
    %0 = vector.load %arg1[%c0, %c0_0] : memref<2x128xf32, #tpu.memory_space<vmem>>, vector<2x128xf32>
    %1 = arith.truncf %0 : vector<2x128xf32> to vector<2x128xbf16>
    %c0_1 = arith.constant 0 : index
    %c0_2 = arith.constant 0 : index
    %2 = vector.load %arg2[%c0_1, %c0_2] : memref<128x64xbf16, #tpu.memory_space<vmem>>, vector<128x64xbf16>
    %cst = arith.constant dense<0.000000e+00> : vector<2x64xf32>
    %3 = tpu.matmul %1, %2, %cst {dimension_numbers = #tpu.dot_dimension_numbers<[1], [0], [0], [1], [0, 0, 1, 1], [], []>} : vector<2x128xbf16>, vector<128x64xbf16>, vector<2x64xf32> -> vector<2x64xf32>
    %c0_3 = arith.constant 0 : index
    %c0_4 = arith.constant 0 : index
    %4 = vector.load %arg3[%c0_3, %c0_4] : memref<1x64xf32, #tpu.memory_space<vmem>>, vector<1x64xf32>
    %5 = vector.broadcast %4 : vector<1x64xf32> to vector<2x64xf32>
    %6 = arith.addf %3, %5 : vector<2x64xf32>
    %cst_5 = arith.constant 0.000000e+00 : f32
    %7 = vector.broadcast %cst_5 : f32 to vector<2x64xf32>
    %8 = arith.maximumf %6, %7 : vector<2x64xf32>
    %9 = arith.truncf %8 : vector<2x64xf32> to vector<2x64xbf16>
    %c0_6 = arith.constant 0 : index
    %c0_7 = arith.constant 0 : index
    %10 = vector.load %arg4[%c0_6, %c0_7] : memref<64x64xbf16, #tpu.memory_space<vmem>>, vector<64x64xbf16>
    %cst_8 = arith.constant dense<0.000000e+00> : vector<2x64xf32>
    %11 = tpu.matmul %9, %10, %cst_8 {dimension_numbers = #tpu.dot_dimension_numbers<[1], [0], [0], [1], [0, 0, 1, 1], [], []>} : vector<2x64xbf16>, vector<64x64xbf16>, vector<2x64xf32> -> vector<2x64xf32>
    %c0_9 = arith.constant 0 : index
    %c0_10 = arith.constant 0 : index
    %12 = vector.load %arg5[%c0_9, %c0_10] : memref<1x64xf32, #tpu.memory_space<vmem>>, vector<1x64xf32>
    %13 = vector.broadcast %12 : vector<1x64xf32> to vector<2x64xf32>
    %14 = arith.addf %11, %13 : vector<2x64xf32>
    %cst_11 = arith.constant 0.000000e+00 : f32
    %15 = vector.broadcast %cst_11 : f32 to vector<2x64xf32>
    %16 = arith.maximumf %14, %15 : vector<2x64xf32>
    %17 = arith.truncf %16 : vector<2x64xf32> to vector<2x64xbf16>
    %c0_12 = arith.constant 0 : index
    %c0_13 = arith.constant 0 : index
    %18 = vector.load %arg6[%c0_12, %c0_13] : memref<64x64xbf16, #tpu.memory_space<vmem>>, vector<64x64xbf16>
    %cst_14 = arith.constant dense<0.000000e+00> : vector<2x64xf32>
    %19 = tpu.matmul %17, %18, %cst_14 {dimension_numbers = #tpu.dot_dimension_numbers<[1], [0], [0], [1], [0, 0, 1, 1], [], []>} : vector<2x64xbf16>, vector<64x64xbf16>, vector<2x64xf32> -> vector<2x64xf32>
    %c0_15 = arith.constant 0 : index
    %c0_16 = arith.constant 0 : index
    %20 = vector.load %arg7[%c0_15, %c0_16] : memref<1x64xf32, #tpu.memory_space<vmem>>, vector<1x64xf32>
    %21 = vector.broadcast %20 : vector<1x64xf32> to vector<2x64xf32>
    %22 = arith.addf %19, %21 : vector<2x64xf32>
    %cst_17 = arith.constant 0.000000e+00 : f32
    %23 = vector.broadcast %cst_17 : f32 to vector<2x64xf32>
    %24 = arith.maximumf %22, %23 : vector<2x64xf32>
    %25 = arith.truncf %24 : vector<2x64xf32> to vector<2x64xbf16>
    %c0_18 = arith.constant 0 : index
    %c0_19 = arith.constant 0 : index
    %26 = vector.load %arg8[%c0_18, %c0_19] : memref<64x64xbf16, #tpu.memory_space<vmem>>, vector<64x64xbf16>
    %cst_20 = arith.constant dense<0.000000e+00> : vector<2x64xf32>
    %27 = tpu.matmul %25, %26, %cst_20 {dimension_numbers = #tpu.dot_dimension_numbers<[1], [0], [0], [1], [0, 0, 1, 1], [], []>} : vector<2x64xbf16>, vector<64x64xbf16>, vector<2x64xf32> -> vector<2x64xf32>
    %c0_21 = arith.constant 0 : index
    %c0_22 = arith.constant 0 : index
    %28 = vector.load %arg9[%c0_21, %c0_22] : memref<1x64xf32, #tpu.memory_space<vmem>>, vector<1x64xf32>
    %29 = vector.broadcast %28 : vector<1x64xf32> to vector<2x64xf32>
    %30 = arith.addf %27, %29 : vector<2x64xf32>
    %cst_23 = arith.constant 0.000000e+00 : f32
    %31 = vector.broadcast %cst_23 : f32 to vector<2x64xf32>
    %32 = arith.maximumf %30, %31 : vector<2x64xf32>
    %33 = arith.truncf %32 : vector<2x64xf32> to vector<2x64xbf16>
    %c0_24 = arith.constant 0 : index
    %c0_25 = arith.constant 0 : index
    %34 = vector.load %arg10[%c0_24, %c0_25] : memref<64x16xbf16, #tpu.memory_space<vmem>>, vector<64x16xbf16>
    %cst_26 = arith.constant dense<0.000000e+00> : vector<2x16xf32>
    %35 = tpu.matmul %33, %34, %cst_26 {dimension_numbers = #tpu.dot_dimension_numbers<[1], [0], [0], [1], [0, 0, 1, 1], [], []>} : vector<2x64xbf16>, vector<64x16xbf16>, vector<2x16xf32> -> vector<2x16xf32>
    %c0_27 = arith.constant 0 : index
    %c0_28 = arith.constant 0 : index
    %36 = vector.load %arg11[%c0_27, %c0_28] : memref<1x16xf32, #tpu.memory_space<vmem>>, vector<1x16xf32>
    %37 = vector.broadcast %36 : vector<1x16xf32> to vector<2x16xf32>
    %38 = arith.addf %35, %37 : vector<2x16xf32>
    %c0_29 = arith.constant 0 : index
    %c0_30 = arith.constant 0 : index
    %39 = vector.load %arg12[%c0_29, %c0_30] : memref<2x16xf32, #tpu.memory_space<vmem>>, vector<2x16xf32>
    tpu.vector_store %arg12[%c0_29, %c0_30], %38 {strides = array<i32>} : memref<2x16xf32, #tpu.memory_space<vmem>>, vector<2x16xf32>,
    return
  }
  func.func @transform_0(%arg0: i32) -> (i32, i32) {
    %c0_i32 = arith.constant 0 : i32
    %c0_i32_0 = arith.constant 0 : i32
    return %arg0, %c0_i32 : i32, i32
  }
  func.func @transform_1(%arg0: i32) -> (i32, i32) {
    %c0_i32 = arith.constant 0 : i32
    %c0_i32_0 = arith.constant 0 : i32
    %c0_i32_1 = arith.constant 0 : i32
    return %c0_i32, %c0_i32_0 : i32, i32
  }
  func.func @transform_2(%arg0: i32) -> (i32, i32) {
    %c0_i32 = arith.constant 0 : i32
    %c0_i32_0 = arith.constant 0 : i32
    %c0_i32_1 = arith.constant 0 : i32
    return %c0_i32, %c0_i32_0 : i32, i32
  }
  func.func @transform_3(%arg0: i32) -> (i32, i32) {
    %c0_i32 = arith.constant 0 : i32
    %c0_i32_0 = arith.constant 0 : i32
    %c0_i32_1 = arith.constant 0 : i32
    return %c0_i32, %c0_i32_0 : i32, i32
  }
  func.func @transform_4(%arg0: i32) -> (i32, i32) {
    %c0_i32 = arith.constant 0 : i32
    %c0_i32_0 = arith.constant 0 : i32
    %c0_i32_1 = arith.constant 0 : i32
    return %c0_i32, %c0_i32_0 : i32, i32
  }
  func.func @transform_5(%arg0: i32) -> (i32, i32) {
    %c0_i32 = arith.constant 0 : i32
    %c0_i32_0 = arith.constant 0 : i32
    %c0_i32_1 = arith.constant 0 : i32
    return %c0_i32, %c0_i32_0 : i32, i32
  }
  func.func @transform_6(%arg0: i32) -> (i32, i32) {
    %c0_i32 = arith.constant 0 : i32
    %c0_i32_0 = arith.constant 0 : i32
    %c0_i32_1 = arith.constant 0 : i32
    return %c0_i32, %c0_i32_0 : i32, i32
  }
  func.func @transform_7(%arg0: i32) -> (i32, i32) {
    %c0_i32 = arith.constant 0 : i32
    %c0_i32_0 = arith.constant 0 : i32
    %c0_i32_1 = arith.constant 0 : i32
    return %c0_i32, %c0_i32_0 : i32, i32
  }
  func.func @transform_8(%arg0: i32) -> (i32, i32) {
    %c0_i32 = arith.constant 0 : i32
    %c0_i32_0 = arith.constant 0 : i32
    %c0_i32_1 = arith.constant 0 : i32
    return %c0_i32, %c0_i32_0 : i32, i32
  }
  func.func @transform_9(%arg0: i32) -> (i32, i32) {
    %c0_i32 = arith.constant 0 : i32
    %c0_i32_0 = arith.constant 0 : i32
    %c0_i32_1 = arith.constant 0 : i32
    return %c0_i32, %c0_i32_0 : i32, i32
  }
  func.func @transform_10(%arg0: i32) -> (i32, i32) {
    %c0_i32 = arith.constant 0 : i32
    %c0_i32_0 = arith.constant 0 : i32
    %c0_i32_1 = arith.constant 0 : i32
    return %c0_i32, %c0_i32_0 : i32, i32
  }
  func.func @transform_11(%arg0: i32) -> (i32, i32) {
    %c0_i32 = arith.constant 0 : i32
    %c0_i32_0 = arith.constant 0 : i32
    return %arg0, %c0_i32 : i32, i32
  }
}

</mosaic_0001>

<bundles_post_ra>
// kernel: deepset_forward.1
= control target key start
LH: loop header
LB: loop body
LE: loop exit
PB: predicated region body
PF: predicated region fallthrough
CT: control target
= control target key end

     0   :  { %v687_v1 = vmov 0.0   ;;  %vm688_vm0 = vmmov 0   ;;  %s890_s0 = inlined_call_operand.vmem [shape: f32[2,128], index: 0, kind: input, shape index: {}]   ;;  %s891_s1 = inlined_call_operand.vmem [shape: bf16[128,64], index: 1, kind: input, shape index: {}]   ;;  %s892_s2 = inlined_call_operand.vmem [shape: f32[1,64], index: 2, kind: input, shape index: {}]   ;;  %s893_s3 = inlined_call_operand.vmem [shape: bf16[64,64], index: 3, kind: input, shape index: {}]   ;;  %s894_s4 = inlined_call_operand.vmem [shape: f32[1,64], index: 4, kind: input, shape index: {}]   ;;  %s895_s5 = inlined_call_operand.vmem [shape: bf16[64,64], index: 5, kind: input, shape index: {}]   ;;  %s896_s6 = inlined_call_operand.vmem [shape: f32[1,64], index: 6, kind: input, shape index: {}]   ;;  %s897_s7 = inlined_call_operand.vmem [shape: bf16[64,64], index: 7, kind: input, shape index: {}]   ;;  %s898_s8 = inlined_call_operand.vmem [shape: f32[1,64], index: 8, kind: input, shape index: {}]   ;;  %s899_s9 = inlined_call_operand.vmem [shape: bf16[64,16], index: 9, kind: input, shape index: {}]   ;;  %s900_s10 = inlined_call_operand.vmem [shape: f32[1,16], index: 10, kind: input, shape index: {}]   ;;  %s901_s11 = inlined_call_operand.hbm [shape: f32[2,16], index: 11, kind: output, shape index: {}]  }
   0x1   :  { %v639_v0 = vld [vmem:[%s891_s1] sm:$0xff]   ;;  %568 = vmatprep.subr.bf16.mxu0 %v687_v1  ;;  %588 = vmatprep.subr.bf16.mxu1 %v687_v1  ;;  %v640_v2 = vld [vmem:[%s891_s1 + $0x8] sm:$0xff]   ;;  %v641_v3 = vld [vmem:[%s891_s1 + $0x10] sm:$0xff]  }
   0x2   :  { %569 = vmatpush3.bf16.msra.mxu0 %v639_v0  ;;  %584 = vmatprep.mubr.msk.bf16.mxu0 %vm688_vm0, %v687_v1  ;;  %v647_v4 = vld [vmem:[%s893_s3] sm:$0xff]   ;;  %v642_v5 = vld [vmem:[%s891_s1 + $0x18] sm:$0xff]   ;;  %v648_v6 = vld [vmem:[%s893_s3 + $0x8] sm:$0xff]  }
   0x3   :  { %570 = vmatprep.subr.bf16.mxu0 %v687_v1  ;;  %596 = vmatprep.mubr.msk.bf16.mxu1 %vm688_vm0, %v687_v1  ;;  %v643_v7 = vld [vmem:[%s891_s1 + $0x20] sm:$0xff]   ;;  %v644_v8 = vld [vmem:[%s891_s1 + $0x28] sm:$0xff]  }
   0x4   :  { %589 = vmatpush3.bf16.msra.mxu1 %v647_v4 }
   0x5   :  { %590 = vmatprep.subr.bf16.mxu1 %v687_v1 }
   0x6   :  { %571 = vmatpush3.bf16.msra.mxu0 %v640_v2 }
   0x7   :  { %572 = vmatprep.subr.bf16.mxu0 %v687_v1 }
   0x8   :  { %591 = vmatpush3.bf16.msra.mxu1 %v648_v6 }
   0x9   :  { %592 = vmatprep.subr.bf16.mxu1 %v687_v1 }
   0xa   :  { %573 = vmatpush3.bf16.msra.mxu0 %v641_v3 }
   0xb   :  { %574 = vmatprep.subr.bf16.mxu0 %v687_v1 }
   0xe   :  { %575 = vmatpush3.bf16.msra.mxu0 %v642_v5 }
   0xf   :  { %576 = vmatprep.subr.bf16.mxu0 %v687_v1 }
  0x12   :  { %577 = vmatpush3.bf16.msra.mxu0 %v643_v7 }
  0x13   :  { %578 = vmatprep.subr.bf16.mxu0 %v687_v1 }
  0x14   :  { %16 = vsyncpa [#allocation3], 0  ;;  %v645_v9 = vld [vmem:[%s891_s1 + $0x30] sm:$0xff]   ;;  %v646_v10 = vld [vmem:[%s891_s1 + $0x38] sm:$0xff]   ;;  %vm194_vm1 = vcmask 523264   ;;  %s689_s27 = smov [#allocation2]  }
  0x15   :  { %v40_v11 = vld [vmem:[%s890_s0] sm:$0x3]  ;;  %v649_v13 = vld [vmem:[%s893_s3 + $0x10] sm:$0xff]   ;;  %v650_v14 = vld [vmem:[%s893_s3 + $0x18] sm:$0xff]   ;;  %vm490_vm2 = vcmask 123904  }
  0x16   :  { %579 = vmatpush3.bf16.msra.mxu0 %v644_v8  ;;  %v41_v12 = vpack.c.bf16 %v40_v11, %v40_v11  ;;  %593 = vmatpush3.bf16.msra.mxu1 %v649_v13  ;;  %v506_v15 = vld [vmem:[%s892_s2] ss:$0 sm:$0xff]  ;;  %v652_v24 = vld [vmem:[%s895_s5 + $0x8] sm:$0xff]   ;;  %v653_v25 = vld [vmem:[%s895_s5 + $0x10] sm:$0xff]  }
  0x17   :  { %580 = vmatprep.subr.bf16.mxu0 %v687_v1  ;;  %594 = vmatprep.subr.bf16.mxu1 %v687_v1  ;;  %v651_v22 = vld [vmem:[%s895_s5] sm:$0xff]   ;;  %v654_v26 = vld [vmem:[%s895_s5 + $0x18] sm:$0xff]   ;;  %v656_v28 = vld [vmem:[%s897_s7 + $0x8] sm:$0xff]  }
  0x18   :  { %v655_v27 = vld [vmem:[%s897_s7] sm:$0xff]   ;;  %v657_v37 = vld [vmem:[%s897_s7 + $0x10] sm:$0xff]   ;;  %v658_v38 = vld [vmem:[%s897_s7 + $0x18] sm:$0xff]  }
  0x19   :  { %v515_v29 = vld [vmem:[%s894_s4] ss:$0 sm:$0xff]  ;;  %v660_v40 = vld [vmem:[%s899_s9 + $0x8] sm:$0xff]   ;;  %v661_v49 = vld [vmem:[%s899_s9 + $0x10] sm:$0xff]  }
  0x1a   :  { %581 = vmatpush3.bf16.msra.mxu0 %v645_v9  ;;  %595 = vmatpush3.bf16.msra.mxu1 %v650_v14  ;;  %v659_v39 = vld [vmem:[%s899_s9] sm:$0xff]   ;;  %v662_v50 = vld [vmem:[%s899_s9 + $0x18] sm:$0xff]   ;;  %s498_s9 = sshll.u32 %s689_s27, 4  ;;  %s499_s9 = int_to_ptr.vmem [resolvable:$true] %s498_s9 }
  0x1b   :  { %582 = vmatprep.subr.bf16.mxu0 %v687_v1  ;;  %600 = vmatprep.subr.bf16.mxu1 %v687_v1  ;;  %v521_v41 = vld [vmem:[%s896_s6] ss:$0 sm:$0xff]  ;;  %p668_p1 = scmp.lt.s32.totalorder %s499_s9, %s499_s9 }
  0x1c   :  { %v527_v51 = vld [vmem:[%s898_s8] ss:$0 sm:$0xff]  ;;  %s663_s8 = scalar_lea.vmem %s499_s9, 32 }
  0x1d   :  { %v533_v59 = vld [vmem:[%s900_s10] ss:$0 sm:$0xff]  ;;  %p664_p0 = scmp.ne.s32.totalorder %s499_s9, %s663_s8  ;;  %p669_p2 = scmp.lt.s32.totalorder %s663_s8, %s663_s8 }
  0x1e   :  { %583 = vmatpush3.bf16.msra.mxu0 %v646_v10 }
  0x1f   :  { %612 = vmatprep.subr.bf16.mxu0 %v687_v1  ;;  %p670_p3 = por %p669_p2, %p668_p1 }
  0x21   :  { %585 = vmatmul.mubr.bf16.vlgmr.msra.gmra.mrb[0].mxu0 %v41_v12  ;;  %p671_p4 = pnand %p670_p3, %p664_p0 }
  0x22   :  { %620 = vmatprep.mubr.msk.bf16.mxu0 %vm688_vm0, %v687_v1  ;;  %613 = vmatpush3.bf16.msra.mxu0 %v655_v27 }
  0x23   :  { %614 = vmatprep.subr.bf16.mxu0 %v687_v1 }
  0x26   :  { %615 = vmatpush3.bf16.msra.mxu0 %v656_v28 }
  0x27   :  { %616 = vmatprep.subr.bf16.mxu0 %v687_v1 }
  0x2a   :  { %617 = vmatpush3.bf16.msra.mxu0 %v657_v37 }
  0x2b   :  { %618 = vmatprep.subr.bf16.mxu0 %v687_v1 }
  0x2e   :  { %619 = vmatpush3.bf16.msra.mxu0 %v658_v38 }
  0xf4   :  { %v147_v16 = vpop.f32.mrb[0].mxu0 }
  0xf5   :  { %v148_v17 = vadd.f32 %v506_v15, %v147_v16  ;;  %v586_v18 = vpop.f32.mrb[1].mxu0 }
  0xf6   :  { %v150_v19 = vpop.f32.mrb[2].mxu0 }
  0xf7   :  { %v153_v20 = vmax.f32 %v148_v17, 0.0  ;;  %v587_v21 = vpop.f32.mrb[3].mxu0 }
  0xf9   :  { %v154_v23 = vpack.c.bf16 %v153_v20, %v153_v20 }
  0xfb   :  { %597 = vmatmul.mubr.msk.bf16.vlgmr.msra.gmra.mrb[0].mxu1 %vm194_vm1, %v154_v23 }
  0xfc   :  { %601 = vmatpush3.bf16.msra.mxu1 %v651_v22  ;;  %608 = vmatprep.mubr.msk.bf16.mxu1 %vm688_vm0, %v687_v1 }
  0xfd   :  { %602 = vmatprep.subr.bf16.mxu1 %v687_v1 }
 0x100   :  { %603 = vmatpush3.bf16.msra.mxu1 %v652_v24 }
 0x101   :  { %604 = vmatprep.subr.bf16.mxu1 %v687_v1 }
 0x104   :  { %605 = vmatpush3.bf16.msra.mxu1 %v653_v25 }
 0x105   :  { %606 = vmatprep.subr.bf16.mxu1 %v687_v1 }
 0x108   :  { %607 = vmatpush3.bf16.msra.mxu1 %v654_v26 }
 0x109   :  { %624 = vmatprep.subr.bf16.mxu1 %v687_v1 }
 0x1ce   :  { %v232_v30 = vpop.f32.mrb[0].mxu1 }
 0x1cf   :  { %v233_v31 = vadd.f32 %v515_v29, %v232_v30  ;;  %v598_v32 = vpop.f32.mrb[1].mxu1 }
 0x1d0   :  { %v235_v33 = vpop.f32.mrb[2].mxu1 }
 0x1d1   :  { %v238_v34 = vmax.f32 %v233_v31, 0.0  ;;  %v599_v35 = vpop.f32.mrb[3].mxu1 }
 0x1d3   :  { %v239_v36 = vpack.c.bf16 %v238_v34, %v238_v34 }
 0x1d5   :  { %609 = vmatmul.mubr.msk.bf16.vlgmr.msra.gmra.mrb[4].mxu1 %vm194_vm1, %v239_v36 }
 0x1d6   :  { %632 = vmatprep.mubr.msk.bf16.mxu1 %vm688_vm0, %v687_v1  ;;  %625 = vmatpush3.bf16.msra.mxu1 %v659_v39 }
 0x1d7   :  { %626 = vmatprep.subr.bf16.mxu1 %v687_v1 }
 0x1da   :  { %627 = vmatpush3.bf16.msra.mxu1 %v660_v40 }
 0x1db   :  { %628 = vmatprep.subr.bf16.mxu1 %v687_v1 }
 0x1de   :  { %629 = vmatpush3.bf16.msra.mxu1 %v661_v49 }
 0x1df   :  { %630 = vmatprep.subr.bf16.mxu1 %v687_v1 }
 0x1e2   :  { %631 = vmatpush3.bf16.msra.mxu1 %v662_v50 }
 0x2a8   :  { %v316_v42 = vpop.f32.mrb[4].mxu1 }
 0x2a9   :  { %v317_v43 = vadd.f32 %v521_v41, %v316_v42  ;;  %v610_v44 = vpop.f32.mrb[5].mxu1 }
 0x2aa   :  { %v319_v45 = vpop.f32.mrb[6].mxu1 }
 0x2ab   :  { %v322_v46 = vmax.f32 %v317_v43, 0.0  ;;  %v611_v47 = vpop.f32.mrb[7].mxu1 }
 0x2ad   :  { %v323_v48 = vpack.c.bf16 %v322_v46, %v322_v46 }
 0x2af   :  { %621 = vmatmul.mubr.msk.bf16.vlgmr.msra.gmra.mrb[4].mxu0 %vm194_vm1, %v323_v48 }
 0x382   :  { %v400_v52 = vpop.f32.mrb[4].mxu0 }
 0x383   :  { %v401_v53 = vadd.f32 %v527_v51, %v400_v52  ;;  %v622_v54 = vpop.f32.mrb[5].mxu0 }
 0x384   :  { %v403_v55 = vpop.f32.mrb[6].mxu0 }
 0x385   :  { %v406_v56 = vmax.f32 %v401_v53, 0.0  ;;  %v623_v57 = vpop.f32.mrb[7].mxu0 }
 0x387   :  { %v407_v58 = vpack.c.bf16 %v406_v56, %v406_v56 }
 0x389   :  { %633 = vmatmul.mubr.msk.bf16.vlgmr.msra.gmra.mrb[8].mxu1 %vm194_vm1, %v407_v58 }
 0x45c   :  { %v484_v60 = vpop.f32.mrb[8].mxu1 }
 0x45d   :  { %v485_v61 = vadd.f32 %v533_v59, %v484_v60  ;;  %v634_v62 = vpop.f32.mrb[9].mxu1 }
 0x45e   :  { %v487_v63 = vpop.f32.mrb[10].mxu1 }
 0x45f   :  { %v635_v0 = vpop.f32.mrb[11].mxu1  ;;  %491 = vst.msk [vmem:[#allocation2] sm:$0x3] %vm490_vm2, %v485_v61 }
 0x460   :  { %674 = shalt.err (!%p671_p4)
}
 0x461   :  { %s675_s10 = scalar_lea.hbm %s901_s11, 32 }
 0x462   :  { %p676_p5 = scmp.ne.s32.totalorder %s901_s11, %s675_s10  ;;  %p679_p6 = scmp.lt.u32.totalorder %s675_s10, %s901_s11 }
 0x464   :  { %p681_p7 = pnand %p679_p6, %p676_p5 }
 0x466   :  { %684 = shalt.err (!%p681_p7)
}
 0x467   :  { %501 = dma.vmem_to_hbm [thread:$0]  %s499_s9, 32, %s901_s11, [#allocation3]  }
 0x468   :  { %685 = dma.done.wait [#allocation3], 32  }
 0x469   :  { %686 = vsyncadd [#allocation3], 4294967264 }
 0x46a   :  { %505 = vsyncpa [#allocation3], 1 }

</bundles_post_ra>
